<compile_context>
chip_gen: v7x
topology: tpu7x:2x2x1
jax: 0.10.0
libtpu: 0.0.40
codegen_flags: <defaults>
</compile_context>

<pallas_src>
import functools

import jax
import jax.numpy as jnp
from jax.experimental import pallas as pl
from jax.experimental.pallas import tpu as pltpu

LANE = 128


def _round_up(n, m):
    return ((n + m - 1) // m) * m


def _router_kernel(x_ref,
                   w1_ref, b1_ref,      # input_transform        (padded)
                   wf_ref, bf_ref,      # fused [w3a | w2 | w4]   (padded)
                   w3b_ref, b3b_ref,    # mystical_analyzer[2]    (padded)
                   out_ref,
                   *, half, hp, nf, dp,
                   off_fused, off_probs, off_dims, off_sig):
    x = x_ref[...]                                                  # (TB, IN)

    # Stage 1: transformed = relu(x @ W1 + b1), padded to full 128-lane width.
    h = jnp.dot(x, w1_ref[...], preferred_element_type=jnp.float32) + b1_ref[...]
    h = jnp.maximum(h, 0.0)                                         # (TB, HP)

    # Stage 2 (fused MXU pass): lanes [0:half) = mystical mid (pre-ReLU),
    # lanes [half:half+32) = vertex logits, lane [half+32] = raw intensity,
    # remaining lanes are exact zeros (zero-padded weights/bias).
    fused = jnp.dot(h, wf_ref[...], preferred_element_type=jnp.float32) + bf_ref[...]

    # Softmax over the logit lanes, done full-width with a lane mask so no
    # unaligned slicing is required. Non-logit lanes -> exp(-1e30) == 0.
    lane = jax.lax.broadcasted_iota(jnp.int32, fused.shape, 1)
    is_logit = (lane >= half) & (lane < half + 32)
    masked = jnp.where(is_logit, fused, -1e30)
    m = jnp.max(masked, axis=-1, keepdims=True)
    e = jnp.exp(masked - m)
    s = jnp.sum(e, axis=-1, keepdims=True)
    probs = e * pl.reciprocal(s, approx=False)                      # (TB, NF)

    # Stage 3: mystical_analyzer second Linear + Sigmoid. ReLU(fused) is used
    # full-width; w3b rows beyond `half` are zero, so the logit/intensity
    # lanes contribute nothing.
    mid = jnp.maximum(fused, 0.0)
    dims = jnp.dot(mid, w3b_ref[...], preferred_element_type=jnp.float32) + b3b_ref[...]
    dims = jax.nn.sigmoid(dims)                                     # (TB, DP)

    # Full-width sigmoid; the intensity lane is sliced out in the wrapper.
    sig = jax.nn.sigmoid(fused)                                     # (TB, NF)

    # Single lane-dense packed output; every store is 128-lane aligned and
    # full-width (no masked stores, one HBM writeback).
    out_ref[:, 0:hp] = h
    out_ref[:, off_fused:off_fused + nf] = fused
    out_ref[:, off_probs:off_probs + nf] = probs
    out_ref[:, off_dims:off_dims + dp] = dims
    out_ref[:, off_sig:off_sig + nf] = sig


def prepare_params(params):
    """One-time weight prep: fuse the h-consuming matmuls and pad to (8,128) tiles."""
    w1, b1 = params["w1"], params["b1"]
    w2, b2 = params["w2"], params["b2"]
    w3a, b3a = params["w3a"], params["b3a"]
    w3b, b3b = params["w3b"], params["b3b"]
    w4, b4 = params["w4"], params["b4"]

    in_dim, hidden = w1.shape
    half = w3a.shape[1]
    hp = _round_up(hidden, LANE)           # padded width of h
    nf = _round_up(half + 32 + 1, LANE)    # padded width of fused result
    dp = _round_up(5, LANE)                # padded width of dimension activations

    def pad2(a, rows, cols):
        return jnp.pad(a, ((0, rows - a.shape[0]), (0, cols - a.shape[1])))

    # Fused weight: columns ordered [w3a | w2 | w4] so `mid` lands at lane 0.
    wf = jnp.concatenate([w3a, w2, w4], axis=1)     # (H, half+32+1)
    bf = jnp.concatenate([b3a, b2, b4], axis=1)     # (1, half+32+1)

    arrays = {
        "w1": pad2(w1, in_dim, hp), "b1": pad2(b1, 1, hp),
        "wf": pad2(wf, hp, nf),     "bf": pad2(bf, 1, nf),
        "w3b": pad2(w3b, nf, dp),   "b3b": pad2(b3b, 1, dp),
    }
    meta = {"input_dim": in_dim, "hidden": hidden, "half": half,
            "hp": hp, "nf": nf, "dp": dp}
    return arrays, meta


def consciousness_router(x, arrays, meta):
    B, in_dim = x.shape
    H, half = meta["hidden"], meta["half"]
    hp, nf, dp = meta["hp"], meta["nf"], meta["dp"]

    off_fused = hp
    off_probs = hp + nf
    off_dims = hp + 2 * nf
    off_sig = hp + 2 * nf + dp
    out_w = hp + 3 * nf + dp

    # Batch grid: single block at small B; 128-row tiles (split across
    # TensorCores via "parallel") when the batch is large and 128-divisible.
    tb = 128 if (B % 128 == 0) else B
    grid = (B // tb,)

    kernel = functools.partial(
        _router_kernel, half=half, hp=hp, nf=nf, dp=dp,
        off_fused=off_fused, off_probs=off_probs,
        off_dims=off_dims, off_sig=off_sig)

    def wspec(shape):
        return pl.BlockSpec(shape, lambda i: (0, 0))

    packed = pl.pallas_call(
        kernel,
        out_shape=jax.ShapeDtypeStruct((B, out_w), jnp.float32),
        grid=grid,
        in_specs=[
            pl.BlockSpec((tb, in_dim), lambda i: (i, 0)),
            wspec(arrays["w1"].shape), wspec(arrays["b1"].shape),
            wspec(arrays["wf"].shape), wspec(arrays["bf"].shape),
            wspec(arrays["w3b"].shape), wspec(arrays["b3b"].shape),
        ],
        out_specs=pl.BlockSpec((tb, out_w), lambda i: (i, 0)),
        compiler_params=pltpu.CompilerParams(
            dimension_semantics=("parallel",)),
    )(x, arrays["w1"], arrays["b1"], arrays["wf"], arrays["bf"],
      arrays["w3b"], arrays["b3b"])

    return {
        "transformed_input": packed[:, 0:H],
        "vertex_logits": packed[:, off_fused + half: off_fused + half + 32],
        "vertex_probabilities": packed[:, off_probs + half: off_probs + half + 32],
        "dimension_activations": packed[:, off_dims: off_dims + 5],
        "consciousness_intensity": packed[:, off_sig + half + 32: off_sig + half + 33],
    }


def init_params(key, input_dim, hidden_dim):
    """Deterministic synthetic weights, stored as (in_features, out_features)."""
    ks = jax.random.split(key, 10)
    half = hidden_dim // 2

    def lin(kw, kb, fan_in, fan_out):
        bound = 1.0 / (fan_in ** 0.5)
        w = jax.random.uniform(kw, (fan_in, fan_out), jnp.float32, -bound, bound)
        b = jax.random.uniform(kb, (1, fan_out), jnp.float32, -bound, bound)
        return w, b

    w1, b1 = lin(ks[0], ks[1], input_dim, hidden_dim)
    w2, b2 = lin(ks[2], ks[3], hidden_dim, 32)
    w3a, b3a = lin(ks[4], ks[5], hidden_dim, half)
    w3b, b3b = lin(ks[6], ks[7], half, 5)
    w4, b4 = lin(ks[8], ks[9], hidden_dim, 1)
    return {"w1": w1, "b1": b1, "w2": w2, "b2": b2,
            "w3a": w3a, "b3a": b3a, "w3b": w3b, "b3b": b3b,
            "w4": w4, "b4": b4}


def _reference(x, p):
    h = jnp.maximum(x @ p["w1"] + p["b1"], 0.0)
    logits = h @ p["w2"] + p["b2"]
    probs = jax.nn.softmax(logits, axis=-1)
    mid = jnp.maximum(h @ p["w3a"] + p["b3a"], 0.0)
    dims = jax.nn.sigmoid(mid @ p["w3b"] + p["b3b"])
    inten = jax.nn.sigmoid(h @ p["w4"] + p["b4"])
    return {"transformed_input": h, "vertex_logits": logits,
            "vertex_probabilities": probs, "dimension_activations": dims,
            "consciousness_intensity": inten}


if __name__ == "__main__":
    batch, input_dim, hidden_dim = 8, 16, 32

    key = jax.random.PRNGKey(0)
    kx, kp = jax.random.split(key)
    x = jax.random.normal(kx, (batch, input_dim), jnp.float32)
    params = init_params(kp, input_dim, hidden_dim)

    arrays, meta = prepare_params(params)
    out = consciousness_router(x, arrays, meta)
    jax.block_until_ready(out)

    ref = _reference(x, params)
    for name in out:
        assert out[name].shape == ref[name].shape, name
        assert jnp.allclose(out[name], ref[name], atol=1e-5, rtol=1e-5), name

    print("KERNEL_OK")
</pallas_src>

<mosaic_0001>
module attributes {stable_mosaic.version = 11 : i64} {
  func.func @_router_kernel(%arg0: i32, %arg1: memref<8x16xf32, #tpu.memory_space<vmem>>, %arg2: memref<16x128xf32, #tpu.memory_space<vmem>>, %arg3: memref<1x128xf32, #tpu.memory_space<vmem>>, %arg4: memref<128x128xf32, #tpu.memory_space<vmem>>, %arg5: memref<1x128xf32, #tpu.memory_space<vmem>>, %arg6: memref<128x128xf32, #tpu.memory_space<vmem>>, %arg7: memref<1x128xf32, #tpu.memory_space<vmem>>, %arg8: memref<8x640xf32, #tpu.memory_space<vmem>>) attributes {dimension_semantics = [#tpu.dimension_semantics<parallel>], iteration_bounds = array<i64: 1>, scalar_prefetch = 0 : i64, scratch_operands = 0 : i64, tpu.core_type = #tpu.core_type<tc>, window_params = [{transform_indices = @transform_0, window_bounds = array<i64: 8, 16>}, {pipeline_mode = #tpu.pipeline_mode<synchronous>, transform_indices = @transform_1, window_bounds = array<i64: 16, 128>}, {pipeline_mode = #tpu.pipeline_mode<synchronous>, transform_indices = @transform_2, window_bounds = array<i64: 1, 128>}, {pipeline_mode = #tpu.pipeline_mode<synchronous>, transform_indices = @transform_3, window_bounds = array<i64: 128, 128>}, {pipeline_mode = #tpu.pipeline_mode<synchronous>, transform_indices = @transform_4, window_bounds = array<i64: 1, 128>}, {pipeline_mode = #tpu.pipeline_mode<synchronous>, transform_indices = @transform_5, window_bounds = array<i64: 128, 128>}, {pipeline_mode = #tpu.pipeline_mode<synchronous>, transform_indices = @transform_6, window_bounds = array<i64: 1, 128>}, {transform_indices = @transform_7, window_bounds = array<i64: 8, 640>}]} {
    %c0 = arith.constant 0 : index
    %c0_0 = arith.constant 0 : index
    %0 = vector.load %arg1[%c0, %c0_0] : memref<8x16xf32, #tpu.memory_space<vmem>>, vector<8x16xf32>
    %c0_1 = arith.constant 0 : index
    %c0_2 = arith.constant 0 : index
    %1 = vector.load %arg2[%c0_1, %c0_2] : memref<16x128xf32, #tpu.memory_space<vmem>>, vector<16x128xf32>
    %cst = arith.constant dense<0.000000e+00> : vector<8x128xf32>
    %2 = tpu.matmul %0, %1, %cst {dimension_numbers = #tpu.dot_dimension_numbers<[1], [0], [0], [1], [0, 0, 1, 1], [], []>} : vector<8x16xf32>, vector<16x128xf32>, vector<8x128xf32> -> vector<8x128xf32>
    %c0_3 = arith.constant 0 : index
    %c0_4 = arith.constant 0 : index
    %3 = vector.load %arg3[%c0_3, %c0_4] : memref<1x128xf32, #tpu.memory_space<vmem>>, vector<1x128xf32>
    %4 = vector.broadcast %3 : vector<1x128xf32> to vector<8x128xf32>
    %5 = arith.addf %2, %4 : vector<8x128xf32>
    %cst_5 = arith.constant 0.000000e+00 : f32
    %6 = vector.broadcast %cst_5 : f32 to vector<8x128xf32>
    %7 = arith.maximumf %5, %6 : vector<8x128xf32>
    %c0_6 = arith.constant 0 : index
    %c0_7 = arith.constant 0 : index
    %8 = vector.load %arg4[%c0_6, %c0_7] : memref<128x128xf32, #tpu.memory_space<vmem>>, vector<128x128xf32>
    %cst_8 = arith.constant dense<0.000000e+00> : vector<8x128xf32>
    %9 = tpu.matmul %7, %8, %cst_8 {dimension_numbers = #tpu.dot_dimension_numbers<[1], [0], [0], [1], [0, 0, 1, 1], [], []>} : vector<8x128xf32>, vector<128x128xf32>, vector<8x128xf32> -> vector<8x128xf32>
    %c0_9 = arith.constant 0 : index
    %c0_10 = arith.constant 0 : index
    %10 = vector.load %arg5[%c0_9, %c0_10] : memref<1x128xf32, #tpu.memory_space<vmem>>, vector<1x128xf32>
    %11 = vector.broadcast %10 : vector<1x128xf32> to vector<8x128xf32>
    %12 = arith.addf %9, %11 : vector<8x128xf32>
    %13 = tpu.iota {dimensions = array<i32: 1>} : vector<8x128xi32>
    %c16_i32 = arith.constant 16 : i32
    %14 = vector.broadcast %c16_i32 : i32 to vector<8x128xi32>
    %15 = arith.cmpi sge, %13, %14 : vector<8x128xi32>
    %c48_i32 = arith.constant 48 : i32
    %16 = vector.broadcast %c48_i32 : i32 to vector<8x128xi32>
    %17 = arith.cmpi slt, %13, %16 : vector<8x128xi32>
    %18 = arith.andi %15, %17 : vector<8x128xi1>
    %cst_11 = arith.constant -1.000000e+30 : f32
    %19 = vector.broadcast %cst_11 : f32 to vector<8x128xf32>
    %20 = arith.select %18, %12, %19 : vector<8x128xi1>, vector<8x128xf32>
    %cst_12 = arith.constant dense<0xFF800000> : vector<8xf32>
    %21 = vector.multi_reduction <maximumf>, %20, %cst_12 [1] : vector<8x128xf32> to vector<8xf32>
    %22 = vector.shape_cast %21 : vector<8xf32> to vector<8x1xf32>
    %23 = vector.broadcast %22 : vector<8x1xf32> to vector<8x128xf32>
    %24 = arith.subf %20, %23 : vector<8x128xf32>
    %25 = math.exp %24 : vector<8x128xf32>
    %cst_13 = arith.constant dense<0.000000e+00> : vector<8xf32>
    %26 = vector.multi_reduction <add>, %25, %cst_13 [1] : vector<8x128xf32> to vector<8xf32>
    %27 = vector.shape_cast %26 : vector<8xf32> to vector<8x1xf32>
    %28 = tpu.reciprocal %27 : vector<8x1xf32> -> vector<8x1xf32>
    %29 = vector.broadcast %28 : vector<8x1xf32> to vector<8x128xf32>
    %30 = arith.mulf %25, %29 : vector<8x128xf32>
    %cst_14 = arith.constant 0.000000e+00 : f32
    %31 = vector.broadcast %cst_14 : f32 to vector<8x128xf32>
    %32 = arith.maximumf %12, %31 : vector<8x128xf32>
    %c0_15 = arith.constant 0 : index
    %c0_16 = arith.constant 0 : index
    %33 = vector.load %arg6[%c0_15, %c0_16] : memref<128x128xf32, #tpu.memory_space<vmem>>, vector<128x128xf32>
    %cst_17 = arith.constant dense<0.000000e+00> : vector<8x128xf32>
    %34 = tpu.matmul %32, %33, %cst_17 {dimension_numbers = #tpu.dot_dimension_numbers<[1], [0], [0], [1], [0, 0, 1, 1], [], []>} : vector<8x128xf32>, vector<128x128xf32>, vector<8x128xf32> -> vector<8x128xf32>
    %c0_18 = arith.constant 0 : index
    %c0_19 = arith.constant 0 : index
    %35 = vector.load %arg7[%c0_18, %c0_19] : memref<1x128xf32, #tpu.memory_space<vmem>>, vector<1x128xf32>
    %36 = vector.broadcast %35 : vector<1x128xf32> to vector<8x128xf32>
    %37 = arith.addf %34, %36 : vector<8x128xf32>
    %38 = arith.negf %37 : vector<8x128xf32>
    %39 = math.exp %38 : vector<8x128xf32>
    %cst_20 = arith.constant 1.000000e+00 : f32
    %40 = vector.broadcast %cst_20 : f32 to vector<8x128xf32>
    %41 = arith.addf %40, %39 : vector<8x128xf32>
    %42 = arith.divf %40, %41 : vector<8x128xf32>
    %43 = arith.negf %12 : vector<8x128xf32>
    %44 = math.exp %43 : vector<8x128xf32>
    %cst_21 = arith.constant 1.000000e+00 : f32
    %45 = vector.broadcast %cst_21 : f32 to vector<8x128xf32>
    %46 = arith.addf %45, %44 : vector<8x128xf32>
    %47 = arith.divf %45, %46 : vector<8x128xf32>
    %c0_22 = arith.constant 0 : index
    %c0_23 = arith.constant 0 : index
    %48 = vector.load %arg8[%c0_22, %c0_23] : memref<8x640xf32, #tpu.memory_space<vmem>>, vector<8x128xf32>
    tpu.vector_store %arg8[%c0_22, %c0_23], %7 {strides = array<i32>} : memref<8x640xf32, #tpu.memory_space<vmem>>, vector<8x128xf32>,
    %c0_24 = arith.constant 0 : index
    %c128 = arith.constant 128 : index
    %49 = vector.load %arg8[%c0_24, %c128] : memref<8x640xf32, #tpu.memory_space<vmem>>, vector<8x128xf32>
    tpu.vector_store %arg8[%c0_24, %c128], %12 {strides = array<i32>} : memref<8x640xf32, #tpu.memory_space<vmem>>, vector<8x128xf32>,
    %c0_25 = arith.constant 0 : index
    %c256 = arith.constant 256 : index
    %50 = vector.load %arg8[%c0_25, %c256] : memref<8x640xf32, #tpu.memory_space<vmem>>, vector<8x128xf32>
    tpu.vector_store %arg8[%c0_25, %c256], %30 {strides = array<i32>} : memref<8x640xf32, #tpu.memory_space<vmem>>, vector<8x128xf32>,
    %c0_26 = arith.constant 0 : index
    %c384 = arith.constant 384 : index
    %51 = vector.load %arg8[%c0_26, %c384] : memref<8x640xf32, #tpu.memory_space<vmem>>, vector<8x128xf32>
    tpu.vector_store %arg8[%c0_26, %c384], %42 {strides = array<i32>} : memref<8x640xf32, #tpu.memory_space<vmem>>, vector<8x128xf32>,
    %c0_27 = arith.constant 0 : index
    %c512 = arith.constant 512 : index
    %52 = vector.load %arg8[%c0_27, %c512] : memref<8x640xf32, #tpu.memory_space<vmem>>, vector<8x128xf32>
    tpu.vector_store %arg8[%c0_27, %c512], %47 {strides = array<i32>} : memref<8x640xf32, #tpu.memory_space<vmem>>, vector<8x128xf32>,
    return
  }
  func.func @transform_0(%arg0: i32) -> (i32, i32) {
    %c0_i32 = arith.constant 0 : i32
    %c0_i32_0 = arith.constant 0 : i32
    return %arg0, %c0_i32 : i32, i32
  }
  func.func @transform_1(%arg0: i32) -> (i32, i32) {
    %c0_i32 = arith.constant 0 : i32
    %c0_i32_0 = arith.constant 0 : i32
    %c0_i32_1 = arith.constant 0 : i32
    return %c0_i32, %c0_i32_0 : i32, i32
  }
  func.func @transform_2(%arg0: i32) -> (i32, i32) {
    %c0_i32 = arith.constant 0 : i32
    %c0_i32_0 = arith.constant 0 : i32
    %c0_i32_1 = arith.constant 0 : i32
    return %c0_i32, %c0_i32_0 : i32, i32
  }
  func.func @transform_3(%arg0: i32) -> (i32, i32) {
    %c0_i32 = arith.constant 0 : i32
    %c0_i32_0 = arith.constant 0 : i32
    %c0_i32_1 = arith.constant 0 : i32
    return %c0_i32, %c0_i32_0 : i32, i32
  }
  func.func @transform_4(%arg0: i32) -> (i32, i32) {
    %c0_i32 = arith.constant 0 : i32
    %c0_i32_0 = arith.constant 0 : i32
    %c0_i32_1 = arith.constant 0 : i32
    return %c0_i32, %c0_i32_0 : i32, i32
  }
  func.func @transform_5(%arg0: i32) -> (i32, i32) {
    %c0_i32 = arith.constant 0 : i32
    %c0_i32_0 = arith.constant 0 : i32
    %c0_i32_1 = arith.constant 0 : i32
    return %c0_i32, %c0_i32_0 : i32, i32
  }
  func.func @transform_6(%arg0: i32) -> (i32, i32) {
    %c0_i32 = arith.constant 0 : i32
    %c0_i32_0 = arith.constant 0 : i32
    %c0_i32_1 = arith.constant 0 : i32
    return %c0_i32, %c0_i32_0 : i32, i32
  }
  func.func @transform_7(%arg0: i32) -> (i32, i32) {
    %c0_i32 = arith.constant 0 : i32
    %c0_i32_0 = arith.constant 0 : i32
    return %arg0, %c0_i32 : i32, i32
  }
}

</mosaic_0001>

<bundles_post_ra>
// kernel: tpu_custom_call.1
= control target key start
LH: loop header
LB: loop body
LE: loop exit
PB: predicated region body
PF: predicated region fallthrough
CT: control target
= control target key end

     0   :  { %12 = vsyncpa [#allocation3], 0  ;;  %s860_s0 = inlined_call_operand.hbm [shape: f32[8,16], index: 0, kind: input, shape index: {}]   ;;  %s861_s1 = inlined_call_operand.hbm [shape: f32[16,128], index: 1, kind: input, shape index: {}]   ;;  %s862_s2 = inlined_call_operand.vmem [shape: f32[1,128], index: 2, kind: input, shape index: {}]   ;;  %s863_s3 = inlined_call_operand.hbm [shape: f32[128,128], index: 3, kind: input, shape index: {}]   ;;  %s864_s4 = inlined_call_operand.vmem [shape: f32[1,128], index: 4, kind: input, shape index: {}]   ;;  %s865_s5 = inlined_call_operand.hbm [shape: f32[128,128], index: 5, kind: input, shape index: {}]   ;;  %s866_s6 = inlined_call_operand.vmem [shape: f32[1,128], index: 6, kind: input, shape index: {}]   ;;  %s867_s7 = inlined_call_operand.hbm [shape: f32[8,640], index: 7, kind: output, shape index: {}]  }
   0x1   :  { %13 = vsyncpa [#allocation6], 0 }
   0x2   :  { %14 = vsyncpa [#allocation9], 0 }
   0x3   :  { %15 = vsyncpa [#allocation4], 0  ;;  %s712_s24 = smov [#allocation5]   ;;  %s594_s28 = scalar_lea.hbm %s861_s1, 256 }
   0x4   :  { %s31_s25 = sshll.u32 %s712_s24, 4  ;;  %p595_p0 = scmp.ne.s32.totalorder %s861_s1, %s594_s28  ;;  %s32_s25 = int_to_ptr.vmem [resolvable:$true] %s31_s25 }
   0x5   :  { %p598_p1 = scmp.lt.u32.totalorder %s594_s28, %s861_s1 }
   0x7   :  { %p600_p2 = pnand %p598_p1, %p595_p0 }
   0x9   :  { %603 = shalt.err (!%p600_p2)
}
   0xa   :  { %s604_s10 = scalar_lea.vmem %s32_s25, 256  ;;  %p609_p4 = scmp.lt.s32.totalorder %s32_s25, %s32_s25 }
   0xb   :  { %p605_p3 = scmp.ne.s32.totalorder %s32_s25, %s604_s10  ;;  %p610_p5 = scmp.lt.s32.totalorder %s604_s10, %s604_s10 }
   0xd   :  { %p611_p6 = por %p610_p5, %p609_p4 }
   0xf   :  { %p612_p7 = pnand %p611_p6, %p605_p3 }
  0x11   :  { %615 = shalt.err (!%p612_p7)
}
  0x12   :  { %s713_s11 = smov 128   ;;  %s714_s12 = smov 8  }
  0x13   :  { %37 = dma.hbm_to_vmem [thread:$0]  %s861_s1, 256, %s32_s25, [#allocation6], %s713_s11, %s713_s11, %s714_s12  }
  0x14   :  { %s715_s15 = smov [#allocation2]   ;;  %s716_s17 = smov [#allocation7]  }
  0x15   :  { %s22_s16 = sshll.u32 %s715_s15, 4  ;;  %s45_s18 = sshll.u32 %s716_s17, 4  ;;  %s23_s16 = int_to_ptr.vmem [resolvable:$true] %s22_s16  ;;  %s46_s18 = int_to_ptr.vmem [resolvable:$true] %s45_s18 }
  0x16   :  { %s616_s21 = scalar_lea.hbm %s860_s0, 128 }
  0x17   :  { %p617_p8 = scmp.ne.s32.totalorder %s860_s0, %s616_s21  ;;  %p620_p9 = scmp.lt.u32.totalorder %s616_s21, %s860_s0 }
  0x19   :  { %p622_p10 = pnand %p620_p9, %p617_p8 }
  0x1b   :  { %625 = shalt.err (!%p622_p10)
}
  0x1c   :  { %s626_s1 = scalar_lea.vmem %s23_s16, 128  ;;  %p631_p12 = scmp.lt.s32.totalorder %s23_s16, %s23_s16 }
  0x1d   :  { %p627_p11 = scmp.ne.s32.totalorder %s23_s16, %s626_s1  ;;  %p632_p13 = scmp.lt.s32.totalorder %s626_s1, %s626_s1 }
  0x1f   :  { %p633_p0 = por %p632_p13, %p631_p12 }
  0x21   :  { %p634_p1 = pnand %p633_p0, %p627_p11 }
  0x23   :  { %637 = shalt.err (!%p634_p1)
}
  0x24   :  { %25 = dma.hbm_to_vmem [thread:$0]  %s860_s0, 128, %s23_s16, [#allocation3]  }
  0x25   :  { %s638_s30 = scalar_lea.hbm %s863_s3, 2048 }
  0x26   :  { %p639_p2 = scmp.ne.s32.totalorder %s863_s3, %s638_s30  ;;  %p642_p3 = scmp.lt.u32.totalorder %s638_s30, %s863_s3 }
  0x28   :  { %p644_p4 = pnand %p642_p3, %p639_p2 }
  0x2a   :  { %647 = shalt.err (!%p644_p4)
}
  0x2b   :  { %s648_s14 = scalar_lea.vmem %s46_s18, 2048  ;;  %p653_p6 = scmp.lt.s32.totalorder %s46_s18, %s46_s18 }
  0x2c   :  { %p649_p5 = scmp.ne.s32.totalorder %s46_s18, %s648_s14  ;;  %p654_p7 = scmp.lt.s32.totalorder %s648_s14, %s648_s14 }
  0x2e   :  { %p655_p8 = por %p654_p7, %p653_p6 }
  0x30   :  { %p656_p9 = pnand %p655_p8, %p649_p5 }
  0x32   :  { %659 = shalt.err (!%p656_p9)
}
  0x33   :  { %51 = dma.hbm_to_vmem [thread:$0]  %s863_s3, 2048, %s46_s18, [#allocation6], %s713_s11, %s713_s11, %s714_s12  }
  0x34   :  { %s717_s16 = smov [#allocation8]   ;;  %s660_s21 = scalar_lea.hbm %s865_s5, 2048 }
  0x35   :  { %s59_s17 = sshll.u32 %s717_s16, 4  ;;  %p661_p10 = scmp.ne.s32.totalorder %s865_s5, %s660_s21  ;;  %s60_s17 = int_to_ptr.vmem [resolvable:$true] %s59_s17 }
  0x36   :  { %p664_p11 = scmp.lt.u32.totalorder %s660_s21, %s865_s5 }
  0x38   :  { %p666_p12 = pnand %p664_p11, %p661_p10 }
  0x3a   :  { %669 = shalt.err (!%p666_p12)
}
  0x3b   :  { %s670_s1 = scalar_lea.vmem %s60_s17, 2048  ;;  %p675_p0 = scmp.lt.s32.totalorder %s60_s17, %s60_s17 }
  0x3c   :  { %p671_p13 = scmp.ne.s32.totalorder %s60_s17, %s670_s1  ;;  %p676_p1 = scmp.lt.s32.totalorder %s670_s1, %s670_s1 }
  0x3e   :  { %p677_p2 = por %p676_p1, %p675_p0 }
  0x40   :  { %p678_p3 = pnand %p677_p2, %p671_p13 }
  0x42   :  { %681 = shalt.err (!%p678_p3)
}
  0x43   :  { %65 = dma.hbm_to_vmem [thread:$0]  %s865_s5, 2048, %s60_s17, [#allocation9], %s713_s11, %s713_s11, %s714_s12  }
  0x44   :  { %704 = dma.done.wait [#allocation3], 128  }
  0x45   :  { %705 = vsyncadd [#allocation3], 4294967168 }
  0x46   :  { %706 = dma.done.wait [#allocation6], 2304  }
  0x47   :  { %707 = vsyncadd [#allocation6], 4294964992 }
  0x48   :  { %708 = dma.done.wait [#allocation9], 2048  }
  0x49   :  { %709 = vsyncadd [#allocation9], 4294965248  ;;  %v718_v0 = vmov 0.0|0.0   ;;  %vm719_vm0 = vmmov 0   ;;  %v720_v1 = vmov 0.0   ;;  %v81_v2 = vld [vmem:[#allocation5] sm:$0xff]  ;;  %v258_v59 = vlaneseq }
  0x4a   :  { %521 = vmatprep.subr.bf16.mxu0 %v718_v0  ;;  %448 = vmatprep.mubr.msk.f32.mxu0 %vm719_vm0, %v720_v1  ;;  %v82_v3 = vld [vmem:[#allocation5 + $0x8] sm:$0xff]  ;;  %v165_v5 = vld [vmem:[#allocation7] sm:$0xff]  ;;  %v166_v6 = vld [vmem:[#allocation7 + $0x8] sm:$0xff]  ;;  %vm90_vm1 = vcmask 130048   ;;  %s721_s27 = smov [#allocation10]  }
  0x4b   :  { %524 = vmatprep.subr.bf16.mxu1 %v718_v0  ;;  %483 = vmatprep.mubr.msk.f32.mxu1 %vm719_vm0, %v720_v1  ;;  %v522_v4 = vpack.c.bf16 %v82_v3, %v81_v2  ;;  %v167_v7 = vld [vmem:[#allocation7 + $0x10] sm:$0xff]  ;;  %v525_v8 = vpack.c.bf16 %v166_v6, %v165_v5  ;;  %v168_v9 = vld [vmem:[#allocation7 + $0x18] sm:$0xff]  ;;  %v80_v10 = vld [vmem:[#allocation2] sm:$0xff]  ;;  %v259_v60 = vand.u32 127, %v258_v59  ;;  %s390_s28 = sshll.u32 %s721_s27, 4  ;;  %s391_s28 = int_to_ptr.vmem [resolvable:$true] %s390_s28 }
  0x4c   :  { %v528_v11 = vpack.c.bf16 %v168_v9, %v167_v7  ;;  %v169_v12 = vld [vmem:[#allocation7 + $0x20] sm:$0xff]  ;;  %v170_v13 = vld [vmem:[#allocation7 + $0x28] sm:$0xff]  ;;  %v171_v15 = vld [vmem:[#allocation7 + $0x30] sm:$0xff]  ;;  %s682_s29 = scalar_lea.vmem %s391_s28, 640  ;;  %p687_p5 = scmp.lt.s32.totalorder %s391_s28, %s391_s28 }
  0x4d   :  { %523 = vmatpush3.bf16.msra.mxu0 %v522_v4  ;;  %526 = vmatpush3.bf16.msra.mxu1 %v525_v8  ;;  %v531_v14 = vpack.c.bf16 %v170_v13, %v169_v12  ;;  %v172_v16 = vld [vmem:[#allocation7 + $0x38] sm:$0xff]  ;;  %v173_v18 = vld [vmem:[#allocation7 + $0x40] sm:$0xff]  ;;  %v174_v19 = vld [vmem:[#allocation7 + $0x48] sm:$0xff]  ;;  %vm260_vm2 = vcmp.ge.s32.totalorder %v259_v60, 16  ;;  %vm261_vm3 = vcmp.lt.s32.totalorder %v259_v60, 48  ;;  %p683_p4 = scmp.ne.s32.totalorder %s391_s28, %s682_s29  ;;  %p688_p6 = scmp.lt.s32.totalorder %s682_s29, %s682_s29 }
  0x4e   :  { %548 = vmatprep.subr.bf16.mxu0 %v718_v0  ;;  %527 = vmatprep.subr.bf16.mxu1 %v718_v0  ;;  %v534_v17 = vpack.c.bf16 %v172_v16, %v171_v15  ;;  %v537_v20 = vpack.c.bf16 %v174_v19, %v173_v18  ;;  %v175_v21 = vld [vmem:[#allocation7 + $0x50] sm:$0xff]  ;;  %v176_v22 = vld [vmem:[#allocation7 + $0x58] sm:$0xff]  ;;  %v177_v24 = vld [vmem:[#allocation7 + $0x60] sm:$0xff] }
  0x4f   :  { %v540_v23 = vpack.c.bf16 %v176_v22, %v175_v21  ;;  %v178_v25 = vld [vmem:[#allocation7 + $0x68] sm:$0xff]  ;;  %v179_v27 = vld [vmem:[#allocation7 + $0x70] sm:$0xff]  ;;  %v180_v28 = vld [vmem:[#allocation7 + $0x78] sm:$0xff]  ;;  %p689_p7 = por %p688_p6, %p687_p5 }
  0x50   :  { %449 = vmatmul.mubr.msk.f32.vlgmr.msra.gmra.mrb[0].mxu0 %vm90_vm1, %v80_v10  ;;  %v543_v26 = vpack.c.bf16 %v178_v25, %v177_v24  ;;  %v546_v29 = vpack.c.bf16 %v180_v28, %v179_v27  ;;  %v274_v30 = vld [vmem:[#allocation8] sm:$0xff]  ;;  %v275_v31 = vld [vmem:[#allocation8 + $0x8] sm:$0xff]  ;;  %v276_v32 = vld [vmem:[#allocation8 + $0x10] sm:$0xff] }
  0x51   :  { %518 = vmatprep.mubr.msk.f32.mxu0 %vm719_vm0, %v720_v1  ;;  %529 = vmatpush3.bf16.msra.mxu1 %v528_v11  ;;  %v549_v33 = vpack.c.bf16 %v275_v31, %v274_v30  ;;  %v277_v34 = vld [vmem:[#allocation8 + $0x18] sm:$0xff]  ;;  %v278_v36 = vld [vmem:[#allocation8 + $0x20] sm:$0xff]  ;;  %v279_v37 = vld [vmem:[#allocation8 + $0x28] sm:$0xff]  ;;  %p690_p8 = pnand %p689_p7, %p683_p4 }
  0x52   :  { %530 = vmatprep.subr.bf16.mxu1 %v718_v0  ;;  %v552_v35 = vpack.c.bf16 %v277_v34, %v276_v32  ;;  %v555_v38 = vpack.c.bf16 %v279_v37, %v278_v36  ;;  %v280_v39 = vld [vmem:[#allocation8 + $0x30] sm:$0xff]  ;;  %v281_v40 = vld [vmem:[#allocation8 + $0x38] sm:$0xff]  ;;  %v282_v42 = vld [vmem:[#allocation8 + $0x40] sm:$0xff] }
  0x53   :  { %550 = vmatpush3.bf16.msra.mxu0 %v549_v33  ;;  %v558_v41 = vpack.c.bf16 %v281_v40, %v280_v39  ;;  %v283_v43 = vld [vmem:[#allocation8 + $0x48] sm:$0xff]  ;;  %v284_v45 = vld [vmem:[#allocation8 + $0x50] sm:$0xff]  ;;  %v285_v46 = vld [vmem:[#allocation8 + $0x58] sm:$0xff] }
  0x54   :  { %551 = vmatprep.subr.bf16.mxu0 %v718_v0  ;;  %v561_v44 = vpack.c.bf16 %v283_v43, %v282_v42  ;;  %v564_v47 = vpack.c.bf16 %v285_v46, %v284_v45  ;;  %v286_v48 = vld [vmem:[#allocation8 + $0x60] sm:$0xff]  ;;  %v287_v49 = vld [vmem:[#allocation8 + $0x68] sm:$0xff]  ;;  %v288_v56 = vld [vmem:[#allocation8 + $0x70] sm:$0xff] }
  0x55   :  { %532 = vmatpush3.bf16.msra.mxu1 %v531_v14  ;;  %v567_v50 = vpack.c.bf16 %v287_v49, %v286_v48  ;;  %v401_v51 = vld [vmem:[%s862_s2] ss:$0 sm:$0xff]  ;;  %v289_v57 = vld [vmem:[#allocation8 + $0x78] sm:$0xff]  ;;  %vm262_vm4 = vmand %vm260_vm2, %vm261_vm3 }
  0x56   :  { %533 = vmatprep.subr.bf16.mxu1 %v718_v0  ;;  %v570_v58 = vpack.c.bf16 %v289_v57, %v288_v56  ;;  %v403_v61 = vld [vmem:[%s864_s4] ss:$0 sm:$0xff] }
  0x57   :  { %553 = vmatpush3.bf16.msra.mxu0 %v552_v35  ;;  %v404_v11 = vld [vmem:[%s866_s6] ss:$0 sm:$0xff] }
  0x58   :  { %554 = vmatprep.subr.bf16.mxu0 %v718_v0 }
  0x59   :  { %535 = vmatpush3.bf16.msra.mxu1 %v534_v17 }
  0x5a   :  { %536 = vmatprep.subr.bf16.mxu1 %v718_v0 }
  0x5b   :  { %556 = vmatpush3.bf16.msra.mxu0 %v555_v38 }
  0x5c   :  { %557 = vmatprep.subr.bf16.mxu0 %v718_v0 }
  0x5d   :  { %538 = vmatpush3.bf16.msra.mxu1 %v537_v20 }
  0x5e   :  { %539 = vmatprep.subr.bf16.mxu1 %v718_v0 }
  0x5f   :  { %559 = vmatpush3.bf16.msra.mxu0 %v558_v41 }
  0x60   :  { %560 = vmatprep.subr.bf16.mxu0 %v718_v0 }
  0x61   :  { %541 = vmatpush3.bf16.msra.mxu1 %v540_v23 }
  0x62   :  { %542 = vmatprep.subr.bf16.mxu1 %v718_v0 }
  0x63   :  { %562 = vmatpush3.bf16.msra.mxu0 %v561_v44 }
  0x64   :  { %563 = vmatprep.subr.bf16.mxu0 %v718_v0 }
  0x65   :  { %544 = vmatpush3.bf16.msra.mxu1 %v543_v26 }
  0x66   :  { %545 = vmatprep.subr.bf16.mxu1 %v718_v0 }
  0x67   :  { %565 = vmatpush3.bf16.msra.mxu0 %v564_v47 }
  0x68   :  { %566 = vmatprep.subr.bf16.mxu0 %v718_v0 }
  0x69   :  { %547 = vmatpush3.bf16.msra.mxu1 %v546_v29 }
  0x6b   :  { %568 = vmatpush3.bf16.msra.mxu0 %v567_v50 }
  0x6c   :  { %569 = vmatprep.subr.bf16.mxu0 %v718_v0 }
  0x6f   :  { %571 = vmatpush3.bf16.msra.mxu0 %v570_v58 }
 0x123   :  { %v160_v52 = vpop.f32.mrb[0].mxu0 }
 0x124   :  { %v161_v53 = vadd.f32 %v401_v51, %v160_v52  ;;  %v450_v54 = vpop.f32.mrb[1].mxu0 }
 0x126   :  { %v164_v55 = vmax.f32 %v161_v53, 0.0 }
 0x128   :  { %379 = vst [vmem:[#allocation10] sm:$0xff] %v164_v55  ;;  %484 = vmatmul.mubr.f32.vlgmr.msra.gmra.mrb[0].mxu1 %v164_v55 }
 0x1fb   :  { %v254_v62 = vpop.f32.mrb[0].mxu1 }
 0x1fc   :  { %v255_v63 = vadd.f32 %v403_v61, %v254_v62  ;;  %v485_v0 = vpop.f32.mrb[1].mxu1 }
 0x1fe   :  { %v406_v1 = vmul.f32 -1.442695, %v255_v63  ;;  %380 = vst [vmem:[#allocation10 + $0x8] sm:$0xff] %v255_v63  ;;  %v263_v2 = vsel %vm262_vm4, %v255_v63, -1e+30  ;;  %v273_v3 = vmax.f32 %v255_v63, 0.0 }
 0x1ff   :  { %264 = vmax.xlane.f32.xlu0 %v263_v2 }
 0x200   :  { %582 = vpow2.f32 %v406_v1  ;;  %519 = vmatmul.mubr.f32.vlgmr.msra.gmra.mrb[2].mxu0 %v273_v3 }
 0x20a   :  { %v583_v4 = vpop.eup %582 }
 0x20b   :  { %v376_v5 = vadd.f32 1.0, %v583_v4 }
 0x20d   :  { %584 = vrcp.f32 %v376_v5 }
 0x217   :  { %v585_v6 = vpop.eup %584 }
 0x218   :  { %383 = vst [vmem:[#allocation10 + $0x20] sm:$0xff] %v585_v6 }
 0x28c   :  { %v265_v7 = vpop.xlane.xlu0 %264 }
 0x28d   :  { %v266_v8 = vsub.f32 %v263_v2, %v265_v7 }
 0x28f   :  { %v267_v9 = vmul.f32 1.442695, %v266_v8 }
 0x291   :  { %586 = vpow2.f32 %v267_v9 }
 0x29b   :  { %v587_v10 = vpop.eup %586 }
 0x29c   :  { %269 = vadd.xlane.f32.xlu0 %v587_v10 }
 0x2d3   :  { %v363_v12 = vpop.f32.mrb[2].mxu0 }
 0x2d4   :  { %v364_v13 = vadd.f32 %v404_v11, %v363_v12  ;;  %v520_v14 = vpop.f32.mrb[3].mxu0 }
 0x2d6   :  { %v405_v15 = vmul.f32 -1.442695, %v364_v13 }
 0x2d8   :  { %588 = vpow2.f32 %v405_v15 }
 0x2e2   :  { %v589_v16 = vpop.eup %588 }
 0x2e3   :  { %v370_v17 = vadd.f32 1.0, %v589_v16 }
 0x2e5   :  { %590 = vrcp.f32 %v370_v17 }
 0x2ef   :  { %v591_v18 = vpop.eup %590 }
 0x2f0   :  { %382 = vst [vmem:[#allocation10 + $0x18] sm:$0xff] %v591_v18 }
 0x329   :  { %v270_v19 = vpop.xlane.xlu0 %269 }
 0x32a   :  { %592 = vrcp.f32 %v270_v19 }
 0x334   :  { %v593_v20 = vpop.eup %592 }
 0x335   :  { %v272_v21 = vmul.f32 %v593_v20, %v587_v10 }
 0x337   :  { %381 = vst [vmem:[#allocation10 + $0x10] sm:$0xff] %v272_v21 }
 0x338   :  { %693 = shalt.err (!%p690_p8)
}
 0x339   :  { %s694_s8 = scalar_lea.hbm %s867_s7, 640 }
 0x33a   :  { %p695_p9 = scmp.ne.s32.totalorder %s867_s7, %s694_s8  ;;  %p698_p10 = scmp.lt.u32.totalorder %s694_s8, %s867_s7 }
 0x33c   :  { %p700_p11 = pnand %p698_p10, %p695_p9 }
 0x33e   :  { %703 = shalt.err (!%p700_p11)
}
 0x33f   :  { %393 = dma.vmem_to_hbm [thread:$0]  %s391_s28, 640, %s867_s7, [#allocation4]  }
 0x340   :  { %710 = dma.done.wait [#allocation4], 640  }
 0x341   :  { %711 = vsyncadd [#allocation4], 4294966656 }
 0x342   :  { %397 = vsyncpa [#allocation3], 1 }
 0x343   :  { %398 = vsyncpa [#allocation6], 1 }
 0x344   :  { %399 = vsyncpa [#allocation9], 1 }
 0x345   :  { %400 = vsyncpa [#allocation4], 1 }

</bundles_post_ra>
